<compile_context>
chip_gen: v5e
topology: v5e:2x2
jax: 0.10.0
libtpu: 0.0.40
codegen_flags: <defaults>
</compile_context>

<pallas_src>
import jax
import jax.numpy as jnp
from jax.experimental import pallas as pl
from jax.experimental.pallas import tpu as pltpu


def _focus_pw_kernel(x_ref, w_ref, b_ref, o_ref):
    """out = SiLU(W_folded @ x + b_folded) for one (batch, spatial-tile) block.

    x_ref: (1, K, S_t)   space-to-depth'd input, K = 4*C1, S_t spatial tile (lanes)
    w_ref: (C2, K)       1x1 conv weight with the BN scale folded in
    b_ref: (C2, 1)       folded BN bias (beta - running_mean * scale)
    o_ref: (1, C2, S_t)
    """
    x = x_ref[0]                                             # (K, S_t)
    w = w_ref[...]                                           # (C2, K)
    y = jnp.dot(w, x, preferred_element_type=jnp.float32)    # MXU matmul -> (C2, S_t)
    y = y + b_ref[...]                                       # broadcast along lanes
    # SiLU: y * sigmoid(y) == y / (1 + exp(-y))
    o_ref[0] = (y / (1.0 + jnp.exp(-y))).astype(o_ref.dtype)


def _pick_spatial_tile(s):
    # Prefer lane-dense tiles that are multiples of 128; otherwise use the full
    # (small) spatial extent, which satisfies the block-shape rule because it
    # equals the array dimension.
    for t in (2048, 1024, 512, 256, 128):
        if s % t == 0:
            return t
    return s


def focus_forward(x, weight, gamma, beta, running_mean, running_var, eps=1e-5):
    """Focus.forward for the default k=1, s=1, g=1, act=SiLU configuration.

    x:       (N, C1, H, W)  NCHW, H and W even
    weight:  (C2, 4*C1)     squeezed 1x1 conv weight
    gamma, beta, running_mean, running_var: (C2,) BatchNorm (inference) parameters
    returns: (N, C2, H//2, W//2)
    """
    n, c1, h, w = x.shape
    assert h % 2 == 0 and w % 2 == 0, "Focus needs even spatial dims"
    c2, k = weight.shape
    assert k == 4 * c1
    ho, wo = h // 2, w // 2
    s = ho * wo

    # ---- space-to-depth (the torch.cat of the 4 parity slices) as pure layout.
    # x5 axes: (N, C, i, hp, j, wp); concat channel index = (wp*2 + hp)*C + c, which
    # matches torch.cat((x[...,::2,::2], x[...,1::2,::2],
    #                    x[...,::2,1::2], x[...,1::2,1::2]), dim=1).
    x5 = x.reshape(n, c1, ho, 2, wo, 2)
    x_s2d = jnp.transpose(x5, (0, 5, 3, 1, 2, 4)).reshape(n, 4 * c1, s)

    # ---- fold eval-mode BatchNorm into the 1x1 conv weight / bias.
    scale = gamma / jnp.sqrt(running_var + eps)                           # (C2,)
    w_folded = (weight * scale[:, None]).astype(jnp.float32)              # (C2, K)
    b_folded = (beta - running_mean * scale).astype(jnp.float32)[:, None] # (C2, 1)

    s_tile = _pick_spatial_tile(s)
    grid = (n, s // s_tile)

    out = pl.pallas_call(
        _focus_pw_kernel,
        out_shape=jax.ShapeDtypeStruct((n, c2, s), x.dtype),
        grid=grid,
        in_specs=[
            pl.BlockSpec((1, 4 * c1, s_tile), lambda b, j: (b, 0, j)),
            pl.BlockSpec((c2, 4 * c1), lambda b, j: (0, 0)),
            pl.BlockSpec((c2, 1), lambda b, j: (0, 0)),
        ],
        out_specs=pl.BlockSpec((1, c2, s_tile), lambda b, j: (b, 0, j)),
        compiler_params=pltpu.CompilerParams(
            dimension_semantics=("parallel", "parallel")),
    )(x_s2d, w_folded, b_folded)

    return out.reshape(n, c2, ho, wo)


if __name__ == "__main__":
    key = jax.random.PRNGKey(0)
    kx, kw, kg, kb, km, kv = jax.random.split(key, 6)

    n, c1, h, w_sp = 2, 4, 16, 16
    c2 = 8
    eps = 1e-5

    x = jax.random.normal(kx, (n, c1, h, w_sp), dtype=jnp.float32)
    weight = 0.1 * jax.random.normal(kw, (c2, 4 * c1), dtype=jnp.float32)
    gamma = 1.0 + 0.1 * jax.random.normal(kg, (c2,), dtype=jnp.float32)
    beta = 0.1 * jax.random.normal(kb, (c2,), dtype=jnp.float32)
    running_mean = 0.1 * jax.random.normal(km, (c2,), dtype=jnp.float32)
    running_var = jax.random.uniform(kv, (c2,), minval=0.5, maxval=1.5,
                                     dtype=jnp.float32)

    out = focus_forward(x, weight, gamma, beta, running_mean, running_var, eps)
    out = jax.block_until_ready(out)

    # ---- pure-JAX reference mirroring the PyTorch module (eval-mode BN).
    y_cat = jnp.concatenate(
        [x[..., ::2, ::2], x[..., 1::2, ::2], x[..., ::2, 1::2], x[..., 1::2, 1::2]],
        axis=1)                                                  # (N, 4C1, Ho, Wo)
    z = jnp.einsum("nkhw,ok->nohw", y_cat, weight)
    z = (z - running_mean[None, :, None, None]) / jnp.sqrt(
        running_var[None, :, None, None] + eps)
    z = z * gamma[None, :, None, None] + beta[None, :, None, None]
    ref = z * jax.nn.sigmoid(z)

    assert out.shape == ref.shape, (out.shape, ref.shape)
    max_err = float(jnp.max(jnp.abs(out - ref)))
    assert jnp.allclose(out, ref, atol=1e-4, rtol=1e-4), f"max abs err {max_err}"

    print("KERNEL_OK")
</pallas_src>

<mosaic_0001>
module attributes {stable_mosaic.version = 11 : i64} {
  func.func @_focus_pw_kernel(%arg0: i32, %arg1: i32, %arg2: memref<1x16x64xf32, #tpu.memory_space<vmem>>, %arg3: memref<8x16xf32, #tpu.memory_space<vmem>>, %arg4: memref<8x1xf32, #tpu.memory_space<vmem>>, %arg5: memref<1x8x64xf32, #tpu.memory_space<vmem>>) attributes {dimension_semantics = [#tpu.dimension_semantics<parallel>, #tpu.dimension_semantics<parallel>], iteration_bounds = array<i64: 2, 1>, scalar_prefetch = 0 : i64, scratch_operands = 0 : i64, tpu.core_type = #tpu.core_type<tc>, window_params = [{transform_indices = @transform_0, window_bounds = array<i64: 1, 16, 64>}, {pipeline_mode = #tpu.pipeline_mode<synchronous>, transform_indices = @transform_1, window_bounds = array<i64: 8, 16>}, {pipeline_mode = #tpu.pipeline_mode<synchronous>, transform_indices = @transform_2, window_bounds = array<i64: 8, 1>}, {transform_indices = @transform_3, window_bounds = array<i64: 1, 8, 64>}]} {
    %c0 = arith.constant 0 : index
    %c0_0 = arith.constant 0 : index
    %c0_1 = arith.constant 0 : index
    %0 = vector.load %arg2[%c0, %c0_0, %c0_1] : memref<1x16x64xf32, #tpu.memory_space<vmem>>, vector<1x16x64xf32>
    %1 = vector.shape_cast %0 : vector<1x16x64xf32> to vector<16x64xf32>
    %c0_2 = arith.constant 0 : index
    %c0_3 = arith.constant 0 : index
    %2 = vector.load %arg3[%c0_2, %c0_3] : memref<8x16xf32, #tpu.memory_space<vmem>>, vector<8x16xf32>
    %cst = arith.constant dense<0.000000e+00> : vector<8x64xf32>
    %3 = tpu.matmul %2, %1, %cst {dimension_numbers = #tpu.dot_dimension_numbers<[1], [0], [0], [1], [0, 0, 1, 1], [], []>} : vector<8x16xf32>, vector<16x64xf32>, vector<8x64xf32> -> vector<8x64xf32>
    %c0_4 = arith.constant 0 : index
    %c0_5 = arith.constant 0 : index
    %4 = vector.load %arg4[%c0_4, %c0_5] : memref<8x1xf32, #tpu.memory_space<vmem>>, vector<8x1xf32>
    %5 = vector.broadcast %4 : vector<8x1xf32> to vector<8x64xf32>
    %6 = arith.addf %3, %5 : vector<8x64xf32>
    %cst_6 = arith.constant 0.000000e+00 : f32
    %7 = vector.broadcast %cst_6 : f32 to vector<8x64xf32>
    %8 = arith.subf %7, %6 : vector<8x64xf32>
    %9 = math.exp %8 : vector<8x64xf32>
    %cst_7 = arith.constant 1.000000e+00 : f32
    %10 = vector.broadcast %cst_7 : f32 to vector<8x64xf32>
    %11 = arith.addf %10, %9 : vector<8x64xf32>
    %12 = arith.divf %6, %11 : vector<8x64xf32>
    %c0_8 = arith.constant 0 : index
    %c0_9 = arith.constant 0 : index
    %c0_10 = arith.constant 0 : index
    %13 = vector.load %arg5[%c0_8, %c0_9, %c0_10] : memref<1x8x64xf32, #tpu.memory_space<vmem>>, vector<1x8x64xf32>
    %14 = vector.shape_cast %13 : vector<1x8x64xf32> to vector<8x64xf32>
    %15 = vector.shape_cast %12 : vector<8x64xf32> to vector<1x8x64xf32>
    tpu.vector_store %arg5[%c0_8, %c0_9, %c0_10], %15 {strides = array<i32>} : memref<1x8x64xf32, #tpu.memory_space<vmem>>, vector<1x8x64xf32>,
    return
  }
  func.func @transform_0(%arg0: i32, %arg1: i32) -> (i32, i32, i32) {
    %c0_i32 = arith.constant 0 : i32
    %c0_i32_0 = arith.constant 0 : i32
    return %arg0, %c0_i32, %arg1 : i32, i32, i32
  }
  func.func @transform_1(%arg0: i32, %arg1: i32) -> (i32, i32) {
    %c0_i32 = arith.constant 0 : i32
    %c0_i32_0 = arith.constant 0 : i32
    %c0_i32_1 = arith.constant 0 : i32
    return %c0_i32, %c0_i32_0 : i32, i32
  }
  func.func @transform_2(%arg0: i32, %arg1: i32) -> (i32, i32) {
    %c0_i32 = arith.constant 0 : i32
    %c0_i32_0 = arith.constant 0 : i32
    %c0_i32_1 = arith.constant 0 : i32
    return %c0_i32, %c0_i32_0 : i32, i32
  }
  func.func @transform_3(%arg0: i32, %arg1: i32) -> (i32, i32, i32) {
    %c0_i32 = arith.constant 0 : i32
    %c0_i32_0 = arith.constant 0 : i32
    return %arg0, %c0_i32, %arg1 : i32, i32, i32
  }
}

</mosaic_0001>

<bundles_post_ra>
// kernel: tpu_custom_call.1
= control target key start
LH: loop header
LB: loop body
LE: loop exit
PB: predicated region body
PF: predicated region fallthrough
CT: control target
= control target key end

     0   :  { %8 = vsyncpa [#allocation3], 0  ;;  %s710_s0 = inlined_call_operand.hbm [shape: f32[2,16,64], index: 0, kind: input, shape index: {}]   ;;  %s711_s1 = inlined_call_operand.vmem [shape: f32[8,16], index: 1, kind: input, shape index: {}]   ;;  %s712_s2 = inlined_call_operand.vmem [shape: f32[8,1], index: 2, kind: input, shape index: {}]   ;;  %s713_s3 = inlined_call_operand.hbm [shape: f32[2,8,64], index: 3, kind: output, shape index: {}]  }
   0x1   :  { %10 = vsyncpa [#allocation3 + $0x1], 0 }
   0x2   :  { %11 = vsyncpa [#allocation4], 0 }
   0x3   :  { %13 = vsyncpa [#allocation4 + $0x1], 0  ;;  %s583_s12 = smov 0   ;;  %s585_s13 = smov 0  }
   0x4   :  { %s587_s14 = smov 0   ;;  %s589_s15 = smov 0  }
   0x5   :  { %s591_s16 = smov 0   ;;  %s593_s17 = smov 0  }
   0x6 LB: > { %s360_s18 = sadd.s32 4294967295, %s558_s17   ;;  %s361_s19 = sadd.s32 4294967294, %s558_s17   ;;  %s558_s17 = sphi %s593_s17, %s19_s17   ;;  %s554_s16 = sphi %s591_s16, %s722_s16   ;;  %s550_s15 = sphi %s589_s15, %s721_s15   ;;  %s546_s14 = sphi %s587_s14, %s720_s14   ;;  %s542_s13 = sphi %s585_s13, %s719_s13   ;;  %s538_s12 = sphi %s583_s12, %s718_s12  }
   0x7   : > { %s31_s20 = sadd.s32 1, %s554_s16  ;;  %s40_s21 = sadd.s32 1, %s546_s14 }
   0x8   : > { %p33_p0 = scmp.ge.s32.totalorder %s31_s20, 2  ;;  %p47_p1 = scmp.ne.s32.totalorder %s546_s14, %s542_s13 }
   0x9   : > { %p48_p2 = scmp.eq.s32.totalorder %s558_s17, 0  ;;  %p53_p3 = scmp.ne.s32.totalorder %s542_s13, %s538_s12 }
   0xa   : > { %s724_s20 = smov (%p33_p0, %s31_s20), 0  ;;  %p54_p5 = scmp.eq.s32.totalorder %s360_s18, 0 }
   0xb   : > { %p624_p4 = por %p48_p2, %p47_p1  ;;  %s35_s23 = ssub.s32 %s554_s16, %s724_s20 }
   0xc   : > { %p121_p6 = scmp.eq.s32.totalorder %s360_s18, 1  ;;  %p38_p7 = scmp.eq.s32.totalorder %s35_s23, 0 }
   0xd   : > { %p630_p8 = por %p54_p5, %p53_p3  ;;  %p127_p10 = scmp.eq.s32.totalorder %s361_s19, 1 }
   0xe   : > { %p634_p9 = por %p121_p6, %p47_p1  ;;  %p363_p12 = scmp.ge.s32.totalorder %s558_s17, 2 }
   0xf   : > { %s639_s26 = scalar_select %p38_p7, %s546_s14, %s40_s21  }
  0x10   : > { %p641_p11 = por %p127_p10, %p53_p3  ;;  %p388_p13 = scmp.lt.s32.totalorder %s558_s17, 2 }
  0x11   : > { %s153_s28 = sand.u32 1, %s546_s14   ;;  %s375_s30 = sshll.u32 %s554_s16, 4 }
  0x12   : > { %s364_s29 = sshll.u32 %s153_s28, 4  ;;  %s163_s6 = scalar_lea.hbm %s710_s0, %s375_s30 }
  0x13   : > { %s157_s7 = scalar_lea.vmem [#allocation2], %s364_s29  ;;  %s164_s9 = sshll.u32 %s163_s6, 4  ;;  %s165_s9 = int_to_ptr.hbm [resolvable:$true] %s164_s9 }
  0x14   : > { %s166_s8 = sshll.u32 %s157_s7, 4  ;;  %p381_p0 = pnand %p388_p13, %p624_p4  ;;  %s167_s8 = int_to_ptr.vmem [resolvable:$true] %s166_s8 }
  0x15   : > { %p367_p1 = scmp.ge.s32.totalorder %s558_s17, 1  ;;  %s154_s10 = scalar_lea.sflag [#allocation3], %s153_s28 }
  0x16   : > { %s560_s11 = smov 128   ;;  %s561_s18 = smov 8  }
  0x17   : > { %383 = dma.hbm_to_vmem [thread:$0]  (!%p381_p0), %s165_s9, 256, %s167_s8, %s154_s10, %s560_s11, %s560_s11, %s561_s18  }
  0x18   : > { %p174_p2 = scmp.lt.s32.totalorder %s558_s17, 3 }
  0x1a   : > { %p175_p3 = pnand %p367_p1, %p174_p2 }
  0x1b   : > { %s657_s19 = sand.u32 (!%p175_p3), 1, %s542_s13  }
  0x1c   : > { %178 = sbr.rel (%p175_p3) target bundleno = 201 (0xc9), region = 32  ;;  %s368_s21 = sshll.u32 (!%p175_p3), %s657_s19, 4 }
  0x1d   : > { %s181_s23 = scalar_lea.sflag (!%p175_p3), [#allocation3], %s657_s19  ;;  %s184_s29 = scalar_lea.vmem (!%p175_p3), [#allocation2], %s368_s21 }
  0x21   : > { %529 = dma.done.wait (%p630_p8), %s181_s23, 256  }
  0x22   : > { %531 = vsyncadd (%p630_p8), %s181_s23, 4294967040  ;;  %v562_v0 = vmov 0   ;;  %v209_v1 = vld [vmem:[%s184_s29 + $0x8] sm:$0xff]  ;;  %v208_v2 = vld [vmem:[%s184_s29] sm:$0xff]  ;;  %vm217_vm0 = vcmask 130048   ;;  %s369_s24 = sshll.u32 %s657_s19, 3 }
  0x23   : > { %441 = vset.pattern.permute.xlu0 %v562_v0  ;;  %235 = vmatpush.msra.mxu0 %v209_v1  ;;  %v210_v3 = vld [vmem:[%s711_s1] sm:$0xff]  ;;  %s372_s5 = sshll.u32 %s550_s15, 3  ;;  %s207_s9 = scalar_lea.vmem [#allocation5], %s369_s24  ;;  %vm260_vm5 = vcmask 523264  }
  0x24   : > { %v211_v4 = vld [vmem:[%s712_s2] sm:$0xff]  ;;  %s274_s8 = scalar_lea.hbm %s713_s3, %s372_s5  ;;  %s276_s10 = sshll.u32 %s207_s9, 4  ;;  %s277_s10 = int_to_ptr.vmem [resolvable:$true] %s276_s10 }
  0x25   : > { %214 = vperm.xlu0 %441, %v211_v4   ;;  %236 = vmatpush.msra.mxu0 %v208_v2  ;;  %s278_s11 = sshll.u32 %s274_s8, 4  ;;  %s263_s15 = scalar_lea.sflag [#allocation4], %s657_s19  ;;  %s279_s11 = int_to_ptr.hbm [resolvable:$true] %s278_s11 }
  0x26   : > { %370 = vmatmul.msk.f32.vlgmr.msra.gmra.mxu0 %vm217_vm0, %v210_v3  ;;  %s490_s18 = sshra.s32 %s279_s11, 4  ;;  %s496_s22 = scalar_lea.hbm %s713_s3, 16  ;;  %s491_s18 = int_to_ptr.hbm [resolvable:$true] %s490_s18 }
  0x27   : > { %s492_s21 = scalar_lea.hbm %s491_s18, 8  ;;  %p497_p7 = scmp.lt.s32.totalorder %s491_s18, %s713_s3 }
  0x28   : > { %p493_p4 = scmp.ne.s32.totalorder %s491_s18, %s492_s21  ;;  %p498_p8 = scmp.lt.s32.totalorder %s496_s22, %s492_s21 }
  0x2a   : > { %p494_p5 = pnand %p493_p4, %p634_p9  ;;  %p499_p10 = por %p498_p8, %p497_p7 }
  0x2c   : > { %p495_p6 = pneg %p494_p5 }
  0x2e   : > { %p500_p13 = pnand %p499_p10, %p495_p6 }
  0x97   : > { %v215_v5 = vpop.permute.xlu0 %214 }
  0xa3   : > { %v238_v6 = vpop.f32.mrf.mxu0 }
  0xa4   : > { %v239_v7 = vadd.f32 %v238_v6, %v215_v5 }
  0xa6   : > { %v241_v8 = vsub.f32 0.0, %v239_v7 }
  0xa8   : > { %v242_v9 = vmul.f32 1.442695, %v241_v8 }
  0xaa   : > { %442 = vpow2.f32 %v242_v9 }
  0xb0   : > { %v443_v10 = vpop.eup %442 }
  0xb1   : > { %v244_v11 = vadd.f32 1.0, %v443_v10 }
  0xb3   : > { %444 = vrcp.f32 %v244_v11  ;;  %v256_v15 = vand.u32 2147483648, %v244_v11  ;;  %v254_v17 = vand.u32 2147483647, %v244_v11  ;;  %vm250_vm2 = vweird.f32 %v244_v11 }
  0xb5   : > { %v257_v19 = vor.u32 1.1754944e-38, %v256_v15  ;;  %vm255_vm4 = vcmp.eq.f32.partialorder %v254_v17, 8.507059e+37 }
  0xb9   : > { %v445_v12 = vpop.eup %444 }
  0xba   : > { %v246_v13 = vmul.f32 %v445_v12, %v244_v11  ;;  %vm251_vm1 = vweird.f32 %v445_v12 }
  0xbb   : > { %vm252_vm3 = vmor %vm250_vm2, %vm251_vm1 }
  0xbc   : > { %v247_v14 = vsub.f32 1.0, %v246_v13 }
  0xbe   : > { %v248_v16 = vmul.f32 %v445_v12, %v247_v14 }
  0xc0   : > { %v249_v18 = vadd.f32 %v445_v12, %v248_v16 }
  0xc2   : > { %v253_v20 = vsel %vm252_vm3, %v445_v12, %v249_v18 }
  0xc3   : > { %v258_v21 = vsel %vm255_vm4, %v257_v19, %v253_v20 }
  0xc4   : > { %v259_v22 = vmul.f32 %v258_v21, %v239_v7 }
  0xc6   : > { %261 = vst.msk [vmem:[%s207_s9] sm:$0xff] %vm260_vm5, %v259_v22 }
  0xc7   : > { %503 = shalt.err (!%p500_p13)
}
  0xc8   : > { %378 = dma.vmem_to_hbm [thread:$0]  (%p634_p9), %s277_s10, 128, %s279_s11, %s263_s15  }
  0xc9 PF: > { %s290_s19 = sand.u32 1, %s538_s12   ;;  %p385_p0 = pnand %p363_p12, %p641_p11 }
  0xca   : > { %s291_s4 = scalar_lea.sflag [#allocation4], %s290_s19 }
  0xcb   : > { %p386_p1 = pneg %p385_p0 }
  0xcd   : > { %533 = dma.done.wait (%p386_p1), %s291_s4, 128  }
  0xce   : > { %535 = vsyncadd (%p386_p1), %s291_s4, 4294967168  ;;  %s19_s17 = sadd.s32 1, %s558_s17   ;;  %s718_s12 = smov %s542_s13 }
  0xcf   : > { %p16_p2 = scmp.ge.s32.totalorder %s19_s17, 4   ;;  %s719_s13 = smov %s546_s14 }
  0xd0   : > { %s720_s14 = smov %s639_s26  ;;  %s721_s15 = smov %s554_s16 }
  0xd1   : > { %s722_s16 = smov %s724_s20  ;;  %18 = sbr.rel (!%p16_p2) target bundleno = 6 (0x6), region = 77 }
  0xd6   :  { %297 = vsyncpa [#allocation3], 1 }
  0xd7   :  { %299 = vsyncpa [#allocation3 + $0x1], 1 }
  0xd8   :  { %300 = vsyncpa [#allocation4], 1 }
  0xd9   :  { %302 = vsyncpa [#allocation4 + $0x1], 1 }

</bundles_post_ra>
